<compile_context>
chip_gen: v7x
topology: tpu7x:2x2x1
jax: 0.10.0
libtpu: 0.0.40
codegen_flags: <defaults>
</compile_context>

<pallas_src>
import functools

import jax
import jax.numpy as jnp
from jax import lax
from jax.experimental import pallas as pl
from jax.experimental.pallas import tpu as pltpu

_HALO_ROWS = 8                      # cross-tile halo rows in folded time (>= ceil(K/s)-1)
_VMEM_LIMIT = 32 * 1024 * 1024      # explicit scoped-VMEM limit; safe on v5e/v6e/v7x


def _round_up(x, m):
    return ((x + m - 1) // m) * m


def _gelu_exact(x):
    # torch.nn.GELU default: 0.5 * x * (1 + erf(x / sqrt(2)))
    return 0.5 * x * (1.0 + lax.erf(x * jnp.float32(0.7071067811865476)))


# ---------------------------------------------------------------------------
# Kernels
# ---------------------------------------------------------------------------

def _conv_accumulate(xm_ref, xh_ref, w_ref, *, n_taps, t_tile, use_mxu):
    """Shifted-matmul conv on a folded-time tile; returns f32 [t_tile, c_out_pad]."""
    x = xm_ref[0].astype(jnp.float32)                       # [t_tile, cf]
    if n_taps > 1:
        halo = xh_ref[0, 0].astype(jnp.float32)             # [_HALO_ROWS, cf]
        x = jnp.concatenate([x, halo], axis=0)              # [t_tile + 8, cf]
    c_out = w_ref.shape[-1]
    acc = jnp.zeros((t_tile, c_out), jnp.float32)
    for q in range(n_taps):                                 # fully unrolled (n_taps <= 2)
        xq = lax.slice_in_dim(x, q, q + t_tile, axis=0)     # [t_tile, cf]
        wq = w_ref[q].astype(jnp.float32)                   # [cf, c_out]
        if use_mxu:
            acc = acc + jnp.dot(xq, wq, preferred_element_type=jnp.float32)
        else:
            # first layer (C_in == 1 -> cf == stride): VPU broadcast-FMA, skip MXU
            for c in range(xq.shape[-1]):
                acc = acc + xq[:, c:c + 1] * wq[c:c + 1, :]
    return acc


def _conv_gelu_kernel(xm_ref, xh_ref, w_ref, o_ref, *, n_taps, t_tile, use_mxu):
    acc = _conv_accumulate(xm_ref, xh_ref, w_ref,
                           n_taps=n_taps, t_tile=t_tile, use_mxu=use_mxu)
    o_ref[0] = _gelu_exact(acc).astype(o_ref.dtype)


def _conv_stats_kernel(xm_ref, xh_ref, w_ref, y_ref, st_ref, *,
                       n_taps, t_tile, use_mxu, t_out):
    """First layer, pass 1: conv output + per-channel sum / sum-of-squares (masked to the
    true T_out) accumulated across the 'arbitrary' T grid axis."""
    ti = pl.program_id(1)

    @pl.when(ti == 0)
    def _():
        st_ref[...] = jnp.zeros_like(st_ref)

    acc = _conv_accumulate(xm_ref, xh_ref, w_ref,
                           n_taps=n_taps, t_tile=t_tile, use_mxu=use_mxu)
    y_ref[0] = acc.astype(y_ref.dtype)

    row = lax.broadcasted_iota(jnp.int32, (t_tile, 1), 0) + ti * t_tile
    acc_m = jnp.where(row < t_out, acc, 0.0)                # mask padded time rows
    sums = jnp.sum(acc_m, axis=0, keepdims=True)            # [1, c_pad]
    sqs = jnp.sum(acc_m * acc_m, axis=0, keepdims=True)     # [1, c_pad]
    st_ref[0] = st_ref[0] + jnp.concatenate([sums, sqs], axis=0)


def _gn_gelu_kernel(y_ref, st_ref, g_ref, b_ref, o_ref, *, inv_n, eps):
    """First layer, pass 2: Fp32GroupNorm (groups == channels) + affine + GELU."""
    y = y_ref[0].astype(jnp.float32)                        # [t_tile, c_pad]
    mean = st_ref[0, 0:1, :] * inv_n                        # [1, c_pad]
    ex2 = st_ref[0, 1:2, :] * inv_n
    var = ex2 - mean * mean                                 # biased variance (torch)
    inv_std = lax.rsqrt(var + eps)
    yn = (y - mean) * inv_std * g_ref[...] + b_ref[...]
    o_ref[0] = _gelu_exact(yn).astype(o_ref.dtype)


# ---------------------------------------------------------------------------
# Wrapper-side layout helpers (free reshapes + tiny halo gather; no K x im2col)
# ---------------------------------------------------------------------------

def _fold_input(x, s, t_out, t_tile):
    """[B, T, C] -> main [B, nt*t_tile, s*C] + 8-row cross-tile halo [B, nt, 8, s*C]."""
    b, t_phys, c = x.shape
    nt = -(-t_out // t_tile)
    tf = nt * t_tile + _HALO_ROWS
    t_need = tf * s
    if t_need > t_phys:
        x = jnp.pad(x, ((0, 0), (0, t_need - t_phys), (0, 0)))
    elif t_need < t_phys:
        x = x[:, :t_need, :]
    xf = x.reshape(b, tf, s * c)                            # stride folded into channels
    xm = xf[:, : nt * t_tile, :]
    xh = jnp.stack(
        [xf[:, (i + 1) * t_tile: (i + 1) * t_tile + _HALO_ROWS, :] for i in range(nt)],
        axis=1)
    return xm, xh, nt


def _fold_weight(w, s, c_in_arr, c_out_pad):
    """torch Conv1d weight [C_out, C_in, K] -> stride-folded taps [n_taps, s*c_in_arr, c_out_pad]:
    tap q, row (r*c_in_arr + ci) holds W[:, ci, q*s + r] (zero outside valid K / real channels)."""
    c_out, c_in, k = w.shape
    n_taps = (k - 1) // s + 1
    wt = jnp.transpose(w, (2, 1, 0)).astype(jnp.float32)    # [K, C_in, C_out]
    wf = jnp.zeros((n_taps, s * c_in_arr, c_out_pad), jnp.float32)
    for q in range(n_taps):
        for r in range(s):
            j = q * s + r
            if j < k:
                wf = wf.at[q, r * c_in_arr: r * c_in_arr + c_in, :c_out].set(wt[j])
    return wf


# ---------------------------------------------------------------------------
# Per-layer pallas_call drivers
# ---------------------------------------------------------------------------

def _conv_layer(x, w, k, s, t_true, *, t_tile, with_stats):
    """x: [B, T_phys, C_in_arr] (channel-padded activations, or raw audio with C=1)."""
    b, _, c_in_arr = x.shape
    c_out = w.shape[0]
    c_pad = _round_up(c_out, 128)                           # lane-dense output channels
    n_taps = (k - 1) // s + 1
    assert n_taps - 1 <= _HALO_ROWS, "kernel/stride ratio too large for halo"
    t_out = (t_true - k) // s + 1
    tt = max(8, min(_round_up(t_tile, 8), _round_up(t_out, 8)))

    xm, xh, nt = _fold_input(x, s, t_out, tt)
    cf = s * c_in_arr
    wf = _fold_weight(w, s, c_in_arr, c_pad)
    use_mxu = cf >= 8                                       # tiny contraction -> VPU path

    in_specs = [
        pl.BlockSpec((1, tt, cf), lambda bi, ti: (bi, ti, 0)),
        pl.BlockSpec((1, 1, _HALO_ROWS, cf), lambda bi, ti: (bi, ti, 0, 0)),
        pl.BlockSpec((n_taps, cf, c_pad), lambda bi, ti: (0, 0, 0)),   # weights resident
    ]
    flops = int(2 * b * nt * tt * n_taps * cf * c_pad)
    io_bytes = int((xm.size + xh.size + wf.size + b * nt * tt * c_pad) * 4)

    if with_stats:
        kernel = functools.partial(_conv_stats_kernel, n_taps=n_taps, t_tile=tt,
                                   use_mxu=use_mxu, t_out=t_out)
        out_shape = (jax.ShapeDtypeStruct((b, nt * tt, c_pad), jnp.float32),
                     jax.ShapeDtypeStruct((b, 2, c_pad), jnp.float32))
        out_specs = (pl.BlockSpec((1, tt, c_pad), lambda bi, ti: (bi, ti, 0)),
                     pl.BlockSpec((1, 2, c_pad), lambda bi, ti: (bi, 0, 0)))
        dims = ("parallel", "arbitrary")                    # stats accumulate over T
        cost = pl.CostEstimate(flops=flops, transcendentals=0, bytes_accessed=io_bytes)
    else:
        kernel = functools.partial(_conv_gelu_kernel, n_taps=n_taps, t_tile=tt,
                                   use_mxu=use_mxu)
        out_shape = jax.ShapeDtypeStruct((b, nt * tt, c_pad), jnp.float32)
        out_specs = pl.BlockSpec((1, tt, c_pad), lambda bi, ti: (bi, ti, 0))
        dims = ("parallel", "parallel")                     # feed both v7x TensorCores
        cost = pl.CostEstimate(flops=flops, transcendentals=int(b * nt * tt * c_pad),
                               bytes_accessed=io_bytes)

    out = pl.pallas_call(
        kernel,
        out_shape=out_shape,
        grid=(b, nt),
        in_specs=in_specs,
        out_specs=out_specs,
        compiler_params=pltpu.CompilerParams(
            dimension_semantics=dims, vmem_limit_bytes=_VMEM_LIMIT),
        cost_estimate=cost,
    )(xm, xh, wf)
    return out, t_out, tt


def _groupnorm_gelu(y, stats, gamma, beta, t_out, t_tile, eps=1e-5):
    b, t_phys, c_pad = y.shape
    nt = t_phys // t_tile
    g = jnp.reshape(gamma, (1, c_pad))
    be = jnp.reshape(beta, (1, c_pad))
    kernel = functools.partial(_gn_gelu_kernel, inv_n=1.0 / float(t_out), eps=float(eps))
    return pl.pallas_call(
        kernel,
        out_shape=jax.ShapeDtypeStruct((b, t_phys, c_pad), jnp.float32),
        grid=(b, nt),
        in_specs=[
            pl.BlockSpec((1, t_tile, c_pad), lambda bi, ti: (bi, ti, 0)),
            pl.BlockSpec((1, 2, c_pad), lambda bi, ti: (bi, 0, 0)),
            pl.BlockSpec((1, c_pad), lambda bi, ti: (0, 0)),
            pl.BlockSpec((1, c_pad), lambda bi, ti: (0, 0)),
        ],
        out_specs=pl.BlockSpec((1, t_tile, c_pad), lambda bi, ti: (bi, ti, 0)),
        compiler_params=pltpu.CompilerParams(
            dimension_semantics=("parallel", "parallel"), vmem_limit_bytes=_VMEM_LIMIT),
        cost_estimate=pl.CostEstimate(flops=int(6 * y.size),
                                      transcendentals=int(y.size),
                                      bytes_accessed=int((2 * y.size + stats.size) * 4)),
    )(y, stats, g, be)


# ---------------------------------------------------------------------------
# Module forward + params
# ---------------------------------------------------------------------------

def init_params(key, conv_layers):
    """Synthetic params: conv weights kaiming_normal_ (std=sqrt(2/fan_in), fan_in=C_in*k),
    GroupNorm affine ones/zeros.  Weight kept in torch layout [C_out, C_in, K]."""
    params = []
    in_d = 1
    for i, (dim, k, stride) in enumerate(conv_layers):
        key, wk = jax.random.split(key)
        std = (2.0 / (in_d * k)) ** 0.5
        w = std * jax.random.normal(wk, (dim, in_d, k), dtype=jnp.float32)
        p = {"w": w, "k": k, "stride": stride}
        if i == 0:  # mode='default': GroupNorm(dim, dim) only on first block
            p["gamma"] = jnp.ones((dim,), jnp.float32)
            p["beta"] = jnp.zeros((dim,), jnp.float32)
        params.append(p)
        in_d = dim
    return params


def wav2vec_feature_extraction(raw_audio, length, params, *, t_tile=256):
    """raw_audio: [B, T] f32, length: [B] int -> (features [B, T', F], length [B])."""
    x = raw_audio[:, :, None].astype(jnp.float32)           # [B, T, C=1], channels-last
    t_true = raw_audio.shape[1]
    length = length.astype(jnp.int32)
    c_out = 1
    for i, p in enumerate(params):
        k, s = p["k"], p["stride"]
        c_out = p["w"].shape[0]
        c_pad = _round_up(c_out, 128)
        if i == 0:
            (y, stats), t_true, tt = _conv_layer(x, p["w"], k, s, t_true,
                                                 t_tile=t_tile, with_stats=True)
            gamma = jnp.pad(p["gamma"], (0, c_pad - c_out), constant_values=1.0)
            beta = jnp.pad(p["beta"], (0, c_pad - c_out), constant_values=0.0)
            x = _groupnorm_gelu(y, stats, gamma, beta, t_true, tt)
        else:
            x, t_true, _ = _conv_layer(x, p["w"], k, s, t_true,
                                       t_tile=t_tile, with_stats=False)
        length = ((length - k) // s + 1).astype(jnp.int32)
    # strip time padding + channel padding once at the end ([B, T', F] == torch transpose)
    return x[:, :t_true, :c_out], length


# ---------------------------------------------------------------------------
# Pure-JAX reference (mirrors the torch module) for a correctness check
# ---------------------------------------------------------------------------

def _reference_forward(raw_audio, length, params):
    x = raw_audio[:, :, None].astype(jnp.float32)
    length = length.astype(jnp.int32)
    for i, p in enumerate(params):
        k, s = p["k"], p["stride"]
        b, t, c = x.shape
        t_out = (t - k) // s + 1
        cols = [x[:, j: j + s * (t_out - 1) + 1: s, :] for j in range(k)]
        patches = jnp.stack(cols, axis=-1).reshape(b, t_out, c * k)      # (ci, j) order
        w_mat = jnp.transpose(p["w"], (1, 2, 0)).reshape(c * k, -1)
        y = patches @ w_mat
        if i == 0:
            mean = jnp.mean(y, axis=1, keepdims=True)
            var = jnp.mean(jnp.square(y - mean), axis=1, keepdims=True)
            y = (y - mean) * lax.rsqrt(var + 1e-5)
            y = y * p["gamma"][None, None, :] + p["beta"][None, None, :]
        x = _gelu_exact(y)
        length = ((length - k) // s + 1).astype(jnp.int32)
    return x, length


if __name__ == "__main__":
    key = jax.random.PRNGKey(0)
    kp, kx = jax.random.split(key)

    # small config: 3 conv layers (dim, kernel, stride)
    conv_layers = [(32, 3, 2), (32, 3, 2), (32, 2, 2)]
    params = init_params(kp, conv_layers)

    B, T = 2, 512
    raw_audio = jax.random.normal(kx, (B, T), dtype=jnp.float32)
    length = jnp.array([512, 400], dtype=jnp.int32)

    feats, out_len = wav2vec_feature_extraction(raw_audio, length, params, t_tile=64)
    jax.block_until_ready(feats)
    jax.block_until_ready(out_len)

    assert feats.shape == (B, 63, 32), feats.shape
    assert feats.dtype == jnp.float32
    assert out_len.shape == (B,)

    ref_feats, ref_len = _reference_forward(raw_audio, length, params)
    assert bool(jnp.all(out_len == ref_len)), (out_len, ref_len)
    err = float(jnp.max(jnp.abs(feats - ref_feats)))
    assert err < 1e-3, f"max abs err vs reference: {err}"
    print("KERNEL_OK")
</pallas_src>

<mosaic_0001>
module attributes {stable_mosaic.version = 11 : i64} {
  func.func @_conv_stats_kernel(%arg0: i32, %arg1: i32, %arg2: memref<1x64x2xf32, #tpu.memory_space<vmem>>, %arg3: memref<1x1x8x2xf32, #tpu.memory_space<vmem>>, %arg4: memref<2x2x128xf32, #tpu.memory_space<vmem>>, %arg5: memref<1x64x128xf32, #tpu.memory_space<vmem>>, %arg6: memref<1x2x128xf32, #tpu.memory_space<vmem>>) attributes {dimension_semantics = [#tpu.dimension_semantics<parallel>, #tpu.dimension_semantics<arbitrary>], iteration_bounds = array<i64: 2, 4>, scalar_prefetch = 0 : i64, scratch_operands = 0 : i64, tpu.core_type = #tpu.core_type<tc>, window_params = [{transform_indices = @transform_0, window_bounds = array<i64: 1, 64, 2>}, {transform_indices = @transform_1, window_bounds = array<i64: 1, 1, 8, 2>}, {pipeline_mode = #tpu.pipeline_mode<synchronous>, transform_indices = @transform_2, window_bounds = array<i64: 2, 2, 128>}, {transform_indices = @transform_3, window_bounds = array<i64: 1, 64, 128>}, {transform_indices = @transform_4, window_bounds = array<i64: 1, 2, 128>}]} {
    %c0_i32 = arith.constant 0 : i32
    %0 = arith.cmpi eq, %arg1, %c0_i32 : i32
    %1 = arith.extui %0 : i1 to i32
    %c0_i32_0 = arith.constant 0 : i32
    %2 = arith.cmpi ne, %1, %c0_i32_0 : i32
    scf.if %2 {
      %cst_24 = arith.constant 0.000000e+00 : f32
      %64 = vector.broadcast %cst_24 : f32 to vector<1x2x128xf32>
      %c0_25 = arith.constant 0 : index
      %c0_26 = arith.constant 0 : index
      %c0_27 = arith.constant 0 : index
      %65 = vector.load %arg6[%c0_25, %c0_26, %c0_27] : memref<1x2x128xf32, #tpu.memory_space<vmem>>, vector<1x2x128xf32>
      tpu.vector_store %arg6[%c0_25, %c0_26, %c0_27], %64 {strides = array<i32>} : memref<1x2x128xf32, #tpu.memory_space<vmem>>, vector<1x2x128xf32>,
    } else {
    }
    %c0 = arith.constant 0 : index
    %c0_1 = arith.constant 0 : index
    %c0_2 = arith.constant 0 : index
    %3 = vector.load %arg2[%c0, %c0_1, %c0_2] : memref<1x64x2xf32, #tpu.memory_space<vmem>>, vector<1x64x2xf32>
    %4 = vector.shape_cast %3 : vector<1x64x2xf32> to vector<64x2xf32>
    %c0_3 = arith.constant 0 : index
    %c0_4 = arith.constant 0 : index
    %c0_5 = arith.constant 0 : index
    %c0_6 = arith.constant 0 : index
    %5 = vector.load %arg3[%c0_3, %c0_4, %c0_5, %c0_6] : memref<1x1x8x2xf32, #tpu.memory_space<vmem>>, vector<1x1x8x2xf32>
    %6 = vector.shape_cast %5 : vector<1x1x8x2xf32> to vector<8x2xf32>
    %7 = tpu.concatenate %4, %6 in 0 : vector<64x2xf32>, vector<8x2xf32> -> vector<72x2xf32>
    %cst = arith.constant 0.000000e+00 : f32
    %8 = vector.broadcast %cst : f32 to vector<64x128xf32>
    %9 = vector.extract_strided_slice %7 {offsets = [0, 0], sizes = [64, 2], strides = [1, 1]} : vector<72x2xf32> to vector<64x2xf32>
    %c0_7 = arith.constant 0 : index
    %c0_8 = arith.constant 0 : index
    %c0_9 = arith.constant 0 : index
    %10 = vector.load %arg4[%c0_7, %c0_8, %c0_9] : memref<2x2x128xf32, #tpu.memory_space<vmem>>, vector<1x2x128xf32>
    %11 = vector.shape_cast %10 : vector<1x2x128xf32> to vector<2x128xf32>
    %12 = vector.extract_strided_slice %9 {offsets = [0, 0], sizes = [64, 1], strides = [1, 1]} : vector<64x2xf32> to vector<64x1xf32>
    %13 = vector.extract_strided_slice %11 {offsets = [0, 0], sizes = [1, 128], strides = [1, 1]} : vector<2x128xf32> to vector<1x128xf32>
    %14 = vector.broadcast %12 : vector<64x1xf32> to vector<64x128xf32>
    %15 = vector.broadcast %13 : vector<1x128xf32> to vector<64x128xf32>
    %16 = arith.mulf %14, %15 : vector<64x128xf32>
    %17 = arith.addf %8, %16 : vector<64x128xf32>
    %18 = vector.extract_strided_slice %9 {offsets = [0, 1], sizes = [64, 1], strides = [1, 1]} : vector<64x2xf32> to vector<64x1xf32>
    %19 = vector.extract_strided_slice %11 {offsets = [1, 0], sizes = [1, 128], strides = [1, 1]} : vector<2x128xf32> to vector<1x128xf32>
    %20 = vector.broadcast %18 : vector<64x1xf32> to vector<64x128xf32>
    %21 = vector.broadcast %19 : vector<1x128xf32> to vector<64x128xf32>
    %22 = arith.mulf %20, %21 : vector<64x128xf32>
    %23 = arith.addf %17, %22 : vector<64x128xf32>
    %24 = vector.extract_strided_slice %7 {offsets = [1, 0], sizes = [64, 2], strides = [1, 1]} : vector<72x2xf32> to vector<64x2xf32>
    %c1 = arith.constant 1 : index
    %c0_10 = arith.constant 0 : index
    %c0_11 = arith.constant 0 : index
    %25 = vector.load %arg4[%c1, %c0_10, %c0_11] : memref<2x2x128xf32, #tpu.memory_space<vmem>>, vector<1x2x128xf32>
    %26 = vector.shape_cast %25 : vector<1x2x128xf32> to vector<2x128xf32>
    %27 = vector.extract_strided_slice %24 {offsets = [0, 0], sizes = [64, 1], strides = [1, 1]} : vector<64x2xf32> to vector<64x1xf32>
    %28 = vector.extract_strided_slice %26 {offsets = [0, 0], sizes = [1, 128], strides = [1, 1]} : vector<2x128xf32> to vector<1x128xf32>
    %29 = vector.broadcast %27 : vector<64x1xf32> to vector<64x128xf32>
    %30 = vector.broadcast %28 : vector<1x128xf32> to vector<64x128xf32>
    %31 = arith.mulf %29, %30 : vector<64x128xf32>
    %32 = arith.addf %23, %31 : vector<64x128xf32>
    %33 = vector.extract_strided_slice %24 {offsets = [0, 1], sizes = [64, 1], strides = [1, 1]} : vector<64x2xf32> to vector<64x1xf32>
    %34 = vector.extract_strided_slice %26 {offsets = [1, 0], sizes = [1, 128], strides = [1, 1]} : vector<2x128xf32> to vector<1x128xf32>
    %35 = vector.broadcast %33 : vector<64x1xf32> to vector<64x128xf32>
    %36 = vector.broadcast %34 : vector<1x128xf32> to vector<64x128xf32>
    %37 = arith.mulf %35, %36 : vector<64x128xf32>
    %38 = arith.addf %32, %37 : vector<64x128xf32>
    %c0_12 = arith.constant 0 : index
    %c0_13 = arith.constant 0 : index
    %c0_14 = arith.constant 0 : index
    %39 = vector.load %arg5[%c0_12, %c0_13, %c0_14] : memref<1x64x128xf32, #tpu.memory_space<vmem>>, vector<1x64x128xf32>
    %40 = vector.shape_cast %39 : vector<1x64x128xf32> to vector<64x128xf32>
    %41 = vector.shape_cast %38 : vector<64x128xf32> to vector<1x64x128xf32>
    tpu.vector_store %arg5[%c0_12, %c0_13, %c0_14], %41 {strides = array<i32>} : memref<1x64x128xf32, #tpu.memory_space<vmem>>, vector<1x64x128xf32>,
    %42 = tpu.iota {dimensions = array<i32: 0>} : vector<64x1xi32>
    %c64_i32 = arith.constant 64 : i32
    %43 = arith.muli %arg1, %c64_i32 : i32
    %44 = vector.broadcast %43 : i32 to vector<64x1xi32>
    %45 = arith.addi %42, %44 : vector<64x1xi32>
    %c255_i32 = arith.constant 255 : i32
    %46 = vector.broadcast %c255_i32 : i32 to vector<64x1xi32>
    %47 = arith.cmpi slt, %45, %46 : vector<64x1xi32>
    %cst_15 = arith.constant 0.000000e+00 : f32
    %48 = vector.shape_cast %47 : vector<64x1xi1> to vector<64x1xi1>
    %49 = vector.broadcast %48 : vector<64x1xi1> to vector<64x128xi1>
    %50 = vector.broadcast %cst_15 : f32 to vector<64x128xf32>
    %51 = arith.select %49, %38, %50 : vector<64x128xi1>, vector<64x128xf32>
    %cst_16 = arith.constant dense<0.000000e+00> : vector<128xf32>
    %52 = vector.multi_reduction <add>, %51, %cst_16 [0] : vector<64x128xf32> to vector<128xf32>
    %53 = vector.shape_cast %52 : vector<128xf32> to vector<1x128xf32>
    %54 = arith.mulf %51, %51 : vector<64x128xf32>
    %cst_17 = arith.constant dense<0.000000e+00> : vector<128xf32>
    %55 = vector.multi_reduction <add>, %54, %cst_17 [0] : vector<64x128xf32> to vector<128xf32>
    %56 = vector.shape_cast %55 : vector<128xf32> to vector<1x128xf32>
    %c0_18 = arith.constant 0 : index
    %c0_19 = arith.constant 0 : index
    %c0_20 = arith.constant 0 : index
    %57 = vector.load %arg6[%c0_18, %c0_19, %c0_20] : memref<1x2x128xf32, #tpu.memory_space<vmem>>, vector<1x2x128xf32>
    %58 = vector.shape_cast %57 : vector<1x2x128xf32> to vector<2x128xf32>
    %59 = tpu.concatenate %53, %56 in 0 : vector<1x128xf32>, vector<1x128xf32> -> vector<2x128xf32>
    %60 = arith.addf %58, %59 : vector<2x128xf32>
    %c0_21 = arith.constant 0 : index
    %c0_22 = arith.constant 0 : index
    %c0_23 = arith.constant 0 : index
    %61 = vector.load %arg6[%c0_21, %c0_22, %c0_23] : memref<1x2x128xf32, #tpu.memory_space<vmem>>, vector<1x2x128xf32>
    %62 = vector.shape_cast %61 : vector<1x2x128xf32> to vector<2x128xf32>
    %63 = vector.shape_cast %60 : vector<2x128xf32> to vector<1x2x128xf32>
    tpu.vector_store %arg6[%c0_21, %c0_22, %c0_23], %63 {strides = array<i32>} : memref<1x2x128xf32, #tpu.memory_space<vmem>>, vector<1x2x128xf32>,
    return
  }
  func.func @transform_0(%arg0: i32, %arg1: i32) -> (i32, i32, i32) {
    %c0_i32 = arith.constant 0 : i32
    %c0_i32_0 = arith.constant 0 : i32
    return %arg0, %arg1, %c0_i32 : i32, i32, i32
  }
  func.func @transform_1(%arg0: i32, %arg1: i32) -> (i32, i32, i32, i32) {
    %c0_i32 = arith.constant 0 : i32
    %c0_i32_0 = arith.constant 0 : i32
    %c0_i32_1 = arith.constant 0 : i32
    return %arg0, %arg1, %c0_i32, %c0_i32_0 : i32, i32, i32, i32
  }
  func.func @transform_2(%arg0: i32, %arg1: i32) -> (i32, i32, i32) {
    %c0_i32 = arith.constant 0 : i32
    %c0_i32_0 = arith.constant 0 : i32
    %c0_i32_1 = arith.constant 0 : i32
    %c0_i32_2 = arith.constant 0 : i32
    return %c0_i32, %c0_i32_0, %c0_i32_1 : i32, i32, i32
  }
  func.func @transform_3(%arg0: i32, %arg1: i32) -> (i32, i32, i32) {
    %c0_i32 = arith.constant 0 : i32
    %c0_i32_0 = arith.constant 0 : i32
    return %arg0, %arg1, %c0_i32 : i32, i32, i32
  }
  func.func @transform_4(%arg0: i32, %arg1: i32) -> (i32, i32, i32) {
    %c0_i32 = arith.constant 0 : i32
    %c0_i32_0 = arith.constant 0 : i32
    %c0_i32_1 = arith.constant 0 : i32
    return %arg0, %c0_i32, %c0_i32_0 : i32, i32, i32
  }
}

</mosaic_0001>

<bundles_post_ra>
// kernel: tpu_custom_call.1
= control target key start
LH: loop header
LB: loop body
LE: loop exit
PB: predicated region body
PF: predicated region fallthrough
CT: control target
= control target key end

     0   :  { %10 = vsyncpa [#allocation3], 0  ;;  %s1489_s0 = inlined_call_operand.vmem [shape: f32[2,256,2], index: 0, kind: input, shape index: {}]   ;;  %s1490_s1 = inlined_call_operand.vmem [shape: f32[2,4,8,2], index: 1, kind: input, shape index: {}]   ;;  %s1491_s2 = inlined_call_operand.vmem [shape: f32[2,2,128], index: 2, kind: input, shape index: {}]   ;;  %s1492_s3 = inlined_call_operand.hbm [shape: f32[2,256,128], index: 3, kind: output, shape index: {0}]   ;;  %s1493_s4 = inlined_call_operand.hbm [shape: f32[2,2,128], index: 4, kind: output, shape index: {1}]  }
   0x1   :  { %12 = vsyncpa [#allocation3 + $0x1], 0 }
   0x2   :  { %13 = vsyncpa [#allocation5], 0 }
   0x3   :  { %15 = vsyncpa [#allocation5 + $0x1], 0  ;;  %s1103_s15 = smov 0   ;;  %s1105_s16 = smov 0  }
   0x4   :  { %s1107_s17 = smov 0   ;;  %s1109_s18 = smov 0  }
   0x5   :  { %s1111_s19 = smov 0   ;;  %s1113_s20 = smov 0  }
   0x6   :  { %s1115_s21 = smov 0   ;;  %s1117_s22 = smov 0  }
   0x7   :  { %s1119_s23 = smov 0   ;;  %s1121_s24 = smov 0  }
   0x8   :  { %s1123_s25 = smov 0  }
   0x9 LB: > { %1508 = sst [smem:[#allocation8_spill]] %s1029_s15  ;;  %s782_s26 = sadd.s32 4294967295, %s1069_s25   ;;  %s1069_s25 = sphi %s1123_s25, %s21_s25   ;;  %s1065_s24 = sphi %s1121_s24, %s1541_s24   ;;  %s1061_s23 = sphi %s1119_s23, %s1540_s23   ;;  %s1057_s22 = sphi %s1117_s22, %s1539_s22   ;;  %s1053_s21 = sphi %s1115_s21, %s1538_s21   ;;  %s1049_s20 = sphi %s1113_s20, %s1537_s20   ;;  %s1045_s19 = sphi %s1111_s19, %s1545_s19   ;;  %s1041_s18 = sphi %s1109_s18, %s1544_s18   ;;  %s1037_s17 = sphi %s1107_s17, %s1535_s17   ;;  %s1033_s16 = sphi %s1105_s16, %s1543_s16   ;;  %s1029_s15 = sphi %s1103_s15, %s1542_s15  }
   0xa   : > { %1509 = sst [smem:[#allocation9_spill]] %s1037_s17  ;;  %s783_s27 = sadd.s32 4294967294, %s1069_s25  }
   0xb   : > { %1510 = sst [smem:[#allocation10_spill]] %s1041_s18  ;;  %s30_s28 = sadd.s32 1, %s1061_s23 }
   0xc   : > { %1511 = sst [smem:[#allocation11_spill]] %s1049_s20  ;;  %s33_s29 = sadd.s32 1, %s1065_s24 }
   0xd   : > { %1512 = sst [smem:[#allocation12_spill]] %s1061_s23  ;;  %p31_p0 = scmp.ge.s32.totalorder %s30_s28, 4 }
   0xe   : > { %1513 = sst [smem:[#allocation13_spill]] %s1065_s24  ;;  %s119_s30 = sadd.s32 1, %s1049_s20 }
   0xf   : > { %1514 = sst [smem:[#allocation14_spill]] %s1069_s25  ;;  %p129_p1 = scmp.ne.s32.totalorder %s1049_s20, %s1045_s19 }
  0x10   : > { %p1165_p2 = scmp.eq.s32.totalorder %s782_s26, 7  ;;  %s1547_s28 = smov (%p31_p0, %s30_s28), 0 }
  0x11   : > { %1516 = sst [smem:[#allocation15_spill]] %s1547_s28  ;;  %s1549_s29 = smov (!%p31_p0, %s33_s29), %s1065_s24 }
  0x12   : > { %s115_s6 = ssub.s32 %s1061_s23, %s1547_s28  ;;  %p1176_p3 = por %p1165_p2, %p129_p1 }
  0x13   : > { %p35_p4 = scmp.ge.s32.totalorder %s1549_s29, 2  ;;  %p135_p5 = scmp.ne.s32.totalorder %s1045_s19, %s1041_s18 }
  0x14   : > { %p1182_p6 = scmp.eq.s32.totalorder %s783_s27, 7  ;;  %s145_s9 = sadd.s32 1, %s1037_s17 }
  0x15   : > { %s1551_s29 = smov (%p35_p4, %s1549_s29), 0  ;;  %p155_p8 = scmp.ne.s32.totalorder %s1037_s17, %s1033_s16 }
  0x16   : > { %1519 = sst [smem:[#allocation16_spill]] %s1551_s29  ;;  %p1191_p7 = por %p1182_p6, %p135_p5 }
  0x17   : > { %s114_s11 = ssub.s32 %s1065_s24, %s1551_s29  ;;  %p161_p9 = scmp.ne.s32.totalorder %s1033_s16, %s1029_s15 }
  0x18   : > { %s1520_s10 = scalar_select %p1191_p7, 1, 0 }
  0x19   : > { %s116_s12 = sor.u32 %s115_s6, %s114_s11  ;;  %p143_p10 = scmp.eq.s32.totalorder %s114_s11, 0 }
  0x1a   : > { %1521 = sst [smem:[#allocation17_spill]] %s1520_s10  ;;  %p117_p11 = scmp.eq.s32.totalorder %s116_s12, 0 }
  0x1b   : > { %p1203_p12 = por %p155_p8, %p1165_p2  ;;  %p1215_p13 = por %p161_p9, %p1182_p6 }
  0x1c   : > { %s1208_s14 = scalar_select %p143_p10, %s1037_s17, %s145_s9  }
  0x1d   : > { %s1211_s26 = scalar_select %p117_p11, %s1049_s20, %s119_s30  }
  0x1e   : > { %1523 = sst [smem:[#allocation18_spill]] %s1208_s14  ;;  %p786_p0 = scmp.ge.s32.totalorder %s1069_s25, 1 }
  0x1f   : > { %1524 = sst [smem:[#allocation19_spill]] %s1211_s26  ;;  %p207_p1 = scmp.lt.s32.totalorder %s1069_s25, 9 }
  0x20   : > { %s1525_s27 = scalar_select %p1215_p13, 1, 0 }
  0x21   : > { %p208_p4 = pnand %p786_p0, %p207_p1 }
  0x22   : > { %1526 = sst [smem:[#allocation20_spill]] %s1525_s27  ;;  %s1499_s30 = sand.u32 (!%p208_p4), 1, %s1045_s19  }
  0x23   : > { %211 = sbr.rel (%p208_p4) target bundleno = 280 (0x118), region = 32  ;;  %s1500_s5 = sand.u32 (!%p208_p4), 1, %s1033_s16  }
  0x24   : > { %s787_s6 = sshll.u32 (!%p208_p4), %s1499_s30, 6  ;;  %s788_s8 = sshll.u32 (!%p208_p4), %s1500_s5, 1 }
  0x25   : > { %s1228_s9 = sshll.u32 (!%p208_p4), %s1053_s21, 3  ;;  %p251_p2 = scmp.lt.s32.totalorder (!%p208_p4), %s1057_s22, 1 }
  0x26   : > { %p253_p5 = scmp.lt.s32.totalorder (!%p208_p4), %s1228_s9, 31  ;;  %p262_p6 = scmp.lt.s32.totalorder (!%p208_p4), %s1053_s21, 3 }
  0x27   : > { %s1246_s18 = scalar_lea.vmem (!%p208_p4), [#allocation2], %s787_s6  ;;  %s1248_s25 = scalar_lea.vmem (!%p208_p4), [#allocation4], %s788_s8 }
  0x28   : > { %p794_p8 = scmp.ne.s32.totalorder (!%p208_p4), %s1053_s21, 0 }
  0x2a   : > { %s252_s11 = scalar_select %p251_p2, %s1057_s22, 1 }
  0x2b   : > { %s254_s12 = scalar_select %p253_p5, %s1228_s9, 31 }
  0x2c   : > { %s790_s29 = sshll.u32 %s252_s11, 5  ;;  %s792_s30 = sshll.u32 %s252_s11, 2  ;;  %v1071_v0 = vmov (!%p794_p8), 0.0  }
  0x2d   : > { %s256_s28 = sadd.s32 %s790_s29, %s254_s12  ;;  %273 = vst [vmem:[%s1248_s25] sm:$0x3] (!%p794_p8), %v1071_v0 }
  0x2e   : > { %s791_s24 = sshll.u32 %s256_s28, 3  ;;  %272 = sbr.rel (%p794_p8) target bundleno = 53 (0x35), region = 36 }
  0x2f   : > { %s1238_s20 = scalar_lea.vmem %s1489_s0, %s791_s24 }
  0x30   : > { %s263_s14 = scalar_select %p262_p6, %s1053_s21, 3 }
  0x32   : > { %s265_s5 = sadd.s32 %s792_s30, %s263_s14 }
  0x33   : > { %s793_s17 = sshll.u32 %s265_s5, 3 }
  0x34   : > { %s1244_s10 = scalar_lea.vmem %s1490_s1, %s793_s17 }
  0x35 PF: > { %v276_v1 = vld [vmem:[%s1238_s20 + $0x10] sm:$0xff]  ;;  %v275_v2 = vld [vmem:[%s1238_s20 + $0x8] sm:$0xff]  ;;  %v1072_v3 = vmov 1   ;;  %v1073_v4 = vmov 0   ;;  %v278_v5 = vld [vmem:[%s1238_s20 + $0x20] sm:$0xff]  ;;  %v324_v12 = vlaneseq  ;;  %s796_s24 = sshll.u32 %s1053_s21, 6 }
  0x36   : > { %912 = vset.pattern.permute.xlu0 %v1072_v3  ;;  %910 = vset.pattern.permute.xlu1 %v1073_v4  ;;  %v274_v6 = vld [vmem:[%s1238_s20] sm:$0xff]  ;;  %v277_v7 = vld [vmem:[%s1238_s20 + $0x18] sm:$0xff]  ;;  %v279_v9 = vld [vmem:[%s1238_s20 + $0x28] sm:$0xff]  ;;  %vm425_vm0 = vcmask 1046528   ;;  %v1293_v44 = vstv %s796_s24  ;;  %s800_s21 = sshll.u32 %s1057_s22, 5  ;;  %s1527_s30 = sand.u32 1, %s1045_s19  }
  0x37   : > { %296 = vperm.xlu1 %910, %v276_v1   ;;  %349 = vperm.xlu0 %912, %v275_v2   ;;  %v281_v8 = vld [vmem:[%s1238_s20 + $0x38] sm:$0xff]  ;;  %v282_v10 = vld [vmem:[%s1244_s10] sm:$0xff]  ;;  %v280_v11 = vld [vmem:[%s1238_s20 + $0x30] sm:$0xff]  ;;  %v1261_v13 = vshrl.u32 %v324_v12, 7  ;;  %s1367_s28 = sadd.s32 %s800_s21, %s1228_s9  ;;  %s637_s10 = sshll.u32 %s1246_s18, 4  ;;  %s1385_s10 = int_to_ptr.vmem [resolvable:$true] %s637_s10 }
  0x38   : > { %v795_v18 = vld [vmem:[%s1491_s2 + $0x2] sm:$0x3]  ;;  %v283_v23 = vld [vmem:[%s1491_s2] sm:$0x3]  ;;  %s801_s29 = sshll.u32 %s1367_s28, 7  ;;  %s1390_s5 = scalar_lea.sflag [#allocation3], %s1527_s30 }
  0x39   : > { %v378_v16 = vsub.s32 1, %v1261_v13  ;;  %v326_v17 = vsub.s32 0, %v1261_v13  ;;  %v528_v40 = vadd.s32 8, %v1261_v13  ;;  %s1383_s27 = scalar_lea.hbm %s1492_s3, %s801_s29  ;;  %s919_s6 = scalar_lea.vmem %s1385_s10, 1024 }
  0x3a   : > { %p920_p9 = scmp.ne.s32.totalorder %s1385_s10, %s919_s6  ;;  %s1074_s8 = smov [#allocation2]  }
  0x3b   : > { %911 = vset.pattern.permute.xlu1 %v1072_v3  ;;  %361 = vperm.xlu0 %912, %v278_v5   ;;  %v1270_v20 = vrot.slane %v795_v18, %v378_v16  ;;  %v1272_v22 = vrot.slane %v795_v18, %v326_v17  ;;  %v1279_v27 = vrot.slane %v283_v23, %v378_v16  ;;  %v529_v16 = vadd.s32 16, %v1261_v13  ;;  %s923_s9 = sshll.u32 %s1074_s8, 4  ;;  %s924_s9 = int_to_ptr.vmem [resolvable:$false] %s923_s9 }
  0x3c   : > { %345 = vperm.xlu1 %911, %v274_v6   ;;  %v1282_v30 = vrot.slane %v283_v23, %v326_v17  ;;  %p921_p10 = pnand %p920_p9, %p1176_p3  ;;  %s925_s11 = scalar_lea.vmem %s924_s9, 2048 }
  0x3d   : > { %p926_p0 = scmp.lt.s32.totalorder %s1385_s10, %s924_s9  ;;  %p927_p1 = scmp.lt.s32.totalorder %s925_s11, %s919_s6 }
  0x3e   : > { %p922_p11 = pneg %p921_p10 }
  0x3f   : > { %916 = vset.pattern.permute.xlu0 %v1073_v4  ;;  %p928_p4 = por %p927_p1, %p926_p0 }
  0x40   : > { %286 = vperm.xlu0 %916, %v274_v6   ;;  %913 = vset.pattern.permute.xlu1 %v1073_v4 }
  0x41   : > { %301 = vperm.xlu1 %913, %v277_v7   ;;  %p929_p2 = pnand %p928_p4, %p922_p11 }
  0x44   : > { %291 = vperm.xlu0 %916, %v275_v2  }
  0x45   : > { %914 = vset.pattern.permute.xlu1 %v1072_v3 }
  0x46   : > { %353 = vperm.xlu1 %914, %v276_v1  }
  0x48   : > { %306 = vperm.xlu0 %916, %v278_v5  }
  0x4a   : > { %357 = vperm.xlu1 %914, %v277_v7  }
  0x4c   : > { %321 = vperm.xlu0 %916, %v281_v8  }
  0x4e   : > { %915 = vset.pattern.permute.xlu1 %v1073_v4 }
  0x4f   : > { %311 = vperm.xlu1 %915, %v279_v9  }
  0x50   : > { %400 = vperm.xlu0 %916, %v282_v10  }
  0x53   : > { %316 = vperm.xlu1 %915, %v280_v11  }
  0x54   : > { %918 = vset.pattern.permute.xlu0 %v1072_v3 }
  0x57   : > { %917 = vset.pattern.permute.xlu1 %v1072_v3 }
  0x58   : > { %365 = vperm.xlu1 %917, %v279_v9  }
  0x5c   : > { %369 = vperm.xlu1 %917, %v280_v11   ;;  %v537_v11 = vadd.s32 %v1293_v44, %v1261_v13 }
  0x5e   : > { %vm545_vm1 = vcmp.lt.s32.totalorder %v537_v11, 255 }
  0x60   : > { %373 = vperm.xlu1 %917, %v281_v8  }
  0x64   : > { %460 = vperm.xlu1 %917, %v282_v10  }
  0xb6   : > { %v297_v14 = vpop.permute.xlu1 %296  ;;  %v350_v15 = vpop.permute.xlu0 %349 }
  0xb7   : > { %v468_v24 = vmul.f32 %v1270_v20, %v350_v15  ;;  %v409_v31 = vmul.f32 %v1272_v22, %v297_v14  ;;  %v381_v32 = vmul.f32 %v1279_v27, %v350_v15  ;;  %v330_v50 = vmul.f32 %v1282_v30, %v297_v14 }
  0xb8   : > { %v538_v14 = vadd.s32 %v1293_v44, %v528_v40 }
  0xb9   : > { %v486_v33 = vrot.slane %v468_v24, 1  ;;  %v429_v41 = vrot.slane %v409_v31, 1  ;;  %v532_v31 = vadd.s32 40, %v1261_v13 }
  0xba   : > { %v1268_v19 = vpop.permute.xlu0 %361  ;;  %vm546_vm2 = vcmp.lt.s32.totalorder %v538_v14, 255 }
  0xbb   : > { %v346_v21 = vpop.permute.xlu1 %345  ;;  %v1300_v51 = vmul.f32 %v1270_v20, %v1268_v19  ;;  %v384_v40 = vmul.f32 %v1279_v27, %v1268_v19 }
  0xbc   : > { %v467_v25 = vmul.f32 %v1270_v20, %v346_v21  ;;  %v380_v42 = vmul.f32 %v1279_v27, %v346_v21  ;;  %v530_v21 = vadd.s32 24, %v1261_v13 }
  0xbd   : > { %v492_v4 = vrot.slane %v1300_v51, 1 }
  0xbe   : > { %v485_v34 = vrot.slane %v467_v25, 1  ;;  %v531_v25 = vadd.s32 32, %v1261_v13 }
  0xbf   : > { %v287_v26 = vpop.permute.xlu0 %286 }
  0xc0   : > { %v407_v28 = vmul.f32 %v1272_v22, %v287_v26  ;;  %v302_v29 = vpop.permute.xlu1 %301  ;;  %v328_v35 = vmul.f32 %v1282_v30, %v287_v26  ;;  %v487_v52 = vsel %vm425_vm0, %v485_v34, %v486_v33 }
  0xc1   : > { %v410_v43 = vmul.f32 %v1272_v22, %v302_v29  ;;  %v331_v55 = vmul.f32 %v1282_v30, %v302_v29 }
  0xc2   : > { %v426_v37 = vrot.slane %v407_v28, 1  ;;  %v388_v53 = vadd.f32 %v380_v42, %v328_v35  ;;  %v540_v35 = vadd.s32 %v1293_v44, %v530_v21 }
  0xc3   : > { %v292_v36 = vpop.permute.xlu0 %291  ;;  %v431_v59 = vrot.slane %v410_v43, 1 }
  0xc4   : > { %v329_v38 = vmul.f32 %v1282_v30, %v292_v36  ;;  %v408_v39 = vmul.f32 %v1272_v22, %v292_v36  ;;  %v541_v36 = vadd.s32 %v1293_v44, %v531_v25  ;;  %vm548_vm4 = vcmp.lt.s32.totalorder %v540_v35, 255 }
  0xc5   : > { %v354_v45 = vpop.permute.xlu1 %353  ;;  %v432_v10 = vsel %vm425_vm0, %v429_v41, %v431_v59 }
  0xc6   : > { %v389_v46 = vadd.f32 %v381_v32, %v329_v38  ;;  %v427_v47 = vrot.slane %v408_v39, 1  ;;  %v382_v48 = vmul.f32 %v1279_v27, %v354_v45  ;;  %v469_v49 = vmul.f32 %v1270_v20, %v354_v45 }
  0xc7   : > { %v307_v54 = vpop.permute.xlu0 %306  ;;  %v539_v32 = vadd.s32 %v1293_v44, %v529_v16  ;;  %v542_v38 = vadd.s32 %v1293_v44, %v532_v31  ;;  %v533_v39 = vadd.s32 48, %v1261_v13  ;;  %vm549_vm5 = vcmp.lt.s32.totalorder %v541_v36, 255 }
  0xc8   : > { %v428_v56 = vsel %vm425_vm0, %v426_v37, %v427_v47  ;;  %v430_v57 = vsel %vm425_vm0, %v427_v47, %v429_v41  ;;  %v488_v58 = vrot.slane %v469_v49, 1  ;;  %v411_v62 = vmul.f32 %v1272_v22, %v307_v54 }
  0xc9   : > { %v451_v60 = vadd.f32 %v428_v56, %v388_v53  ;;  %v452_v61 = vadd.f32 %v430_v57, %v389_v46  ;;  %v358_v63 = vpop.permute.xlu1 %357  ;;  %v390_v0 = vadd.f32 %v382_v48, %v330_v50  ;;  %v332_v41 = vmul.f32 %v1282_v30, %v307_v54 }
  0xca   : > { %v489_v1 = vsel %vm425_vm0, %v486_v33, %v488_v58  ;;  %v383_v2 = vmul.f32 %v1279_v27, %v358_v63  ;;  %v470_v3 = vmul.f32 %v1270_v20, %v358_v63  ;;  %v433_v7 = vrot.slane %v411_v62, 1 }
  0xcb   : > { %v510_v5 = vadd.f32 %v487_v52, %v451_v60  ;;  %v511_v6 = vadd.f32 %v489_v1, %v452_v61  ;;  %v453_v15 = vadd.f32 %v432_v10, %v390_v0  ;;  %v322_v33 = vpop.permute.xlu0 %321  ;;  %vm547_vm3 = vcmp.lt.s32.totalorder %v539_v32, 255 }
  0xcc   : > { %v391_v8 = vadd.f32 %v383_v2, %v331_v55  ;;  %v490_v9 = vrot.slane %v470_v3, 1  ;;  %v434_v12 = vsel %vm425_vm0, %v431_v59, %v433_v7  ;;  %vm550_vm6 = vcmp.lt.s32.totalorder %v542_v38, 255 }
  0xcd   : > { %518 = vst [vmem:[%s1246_s18] sm:$0xff] %v510_v5  ;;  %519 = vst [vmem:[%s1246_s18 + $0x8] sm:$0xff] %v511_v6  ;;  %v569_v43 = vsel %vm545_vm1, %v510_v5, 0.0  ;;  %v570_v45 = vsel %vm546_vm2, %v511_v6, 0.0  ;;  %v1342_v19 = vadd.s32 %v1293_v44, %v533_v39  ;;  %v392_v52 = vadd.f32 %v384_v40, %v332_v41 }
  0xce   : > { %v454_v17 = vadd.f32 %v434_v12, %v391_v8  ;;  %v312_v18 = vpop.permute.xlu1 %311  ;;  %v491_v23 = vsel %vm425_vm0, %v488_v58, %v490_v9  ;;  %v493_v24 = vsel %vm425_vm0, %v490_v9, %v492_v4  ;;  %v414_v54 = vmul.f32 %v1272_v22, %v322_v33 }
  0xcf   : > { %v512_v26 = vadd.f32 %v491_v23, %v453_v15  ;;  %v412_v29 = vmul.f32 %v1272_v22, %v312_v18  ;;  %v401_v48 = vpop.permute.xlu0 %400  ;;  %v333_v55 = vmul.f32 %v1282_v30, %v312_v18  ;;  %v590_v56 = vmul.f32 %v569_v43, %v569_v43 }
  0xd0   : > { %v513_v28 = vadd.f32 %v493_v24, %v454_v17  ;;  %v591_v57 = vmul.f32 %v570_v45, %v570_v45  ;;  %v415_v62 = vmul.f32 %v1272_v22, %v401_v48  ;;  %v577_v6 = vadd.f32 %v570_v45, %v569_v43 }
  0xd1   : > { %520 = vst [vmem:[%s1246_s18 + $0x10] sm:$0xff] %v512_v26  ;;  %v435_v37 = vrot.slane %v412_v29, 1  ;;  %v571_v53 = vsel %vm547_vm3, %v512_v26, 0.0  ;;  %v534_v9 = vadd.s32 56, %v1261_v13  ;;  %v439_v14 = vrot.slane %v414_v54, 1 }
  0xd2   : > { %521 = vst [vmem:[%s1246_s18 + $0x18] sm:$0xff] %v513_v28  ;;  %v317_v34 = vpop.permute.xlu1 %316  ;;  %v572_v60 = vsel %vm548_vm4, %v513_v28, 0.0  ;;  %v592_v1 = vmul.f32 %v571_v53, %v571_v53  ;;  %v578_v12 = vadd.f32 %v577_v6, %v571_v53  ;;  %v441_v18 = vrot.slane %v415_v62, 1 }
  0xd3   : > { %v413_v42 = vmul.f32 %v1272_v22, %v317_v34  ;;  %v436_v47 = vsel %vm425_vm0, %v433_v7, %v435_v37  ;;  %v335_v7 = vmul.f32 %v1282_v30, %v322_v33  ;;  %v598_v22 = vadd.f32 %v591_v57, %v590_v56 }
  0xd4   : > { %v455_v61 = vadd.f32 %v436_v47, %v392_v52  ;;  %v334_v10 = vmul.f32 %v1282_v30, %v317_v34  ;;  %v544_v26 = vadd.s32 %v1293_v44, %v534_v9  ;;  %v579_v34 = vadd.f32 %v578_v12, %v572_v60 }
  0xd5   : > { %v437_v58 = vrot.slane %v413_v42, 1  ;;  %v599_v17 = vadd.f32 %v598_v22, %v592_v1  ;;  %vm551_vm7 = vcmp.lt.s32.totalorder %v1342_v19, 255 }
  0xd6   : > { %vm552_vm8 = vcmp.lt.s32.totalorder %v544_v26, 255 }
  0xd7   : > { %v366_v46 = vpop.permute.xlu1 %365  ;;  %v438_v11 = vsel %vm425_vm0, %v435_v37, %v437_v58  ;;  %v440_v28 = vsel %vm425_vm0, %v437_v58, %v439_v14  ;;  %v442_v37 = vsel %vm425_vm0, %v439_v14, %v441_v18 }
  0xd8   : > { %v385_v49 = vmul.f32 %v1279_v27, %v366_v46  ;;  %v472_v50 = vmul.f32 %v1270_v20, %v366_v46 }
  0xda   : > { %v494_v59 = vrot.slane %v472_v50, 1  ;;  %v393_v63 = vadd.f32 %v385_v49, %v333_v55 }
  0xdb   : > { %v370_v0 = vpop.permute.xlu1 %369 }
  0xdc   : > { %v495_v2 = vsel %vm425_vm0, %v492_v4, %v494_v59  ;;  %v386_v3 = vmul.f32 %v1279_v27, %v370_v0  ;;  %v473_v5 = vmul.f32 %v1270_v20, %v370_v0  ;;  %v593_v4 = vmul.f32 %v572_v60, %v572_v60 }
  0xdd   : > { %v514_v8 = vadd.f32 %v495_v2, %v455_v61  ;;  %v456_v15 = vadd.f32 %v438_v11, %v393_v63 }
  0xde   : > { %v496_v51 = vrot.slane %v473_v5, 1  ;;  %v394_v21 = vadd.f32 %v386_v3, %v334_v10  ;;  %v600_v44 = vadd.f32 %v599_v17, %v593_v4 }
  0xdf   : > { %522 = vst [vmem:[%s1246_s18 + $0x20] sm:$0xff] %v514_v8  ;;  %v374_v16 = vpop.permute.xlu1 %373  ;;  %v573_v30 = vsel %vm549_vm5, %v514_v8, 0.0 }
  0xe0   : > { %v497_v13 = vsel %vm425_vm0, %v494_v59, %v496_v51  ;;  %v387_v24 = vmul.f32 %v1279_v27, %v374_v16  ;;  %v474_v25 = vmul.f32 %v1270_v20, %v374_v16  ;;  %v594_v35 = vmul.f32 %v573_v30, %v573_v30 }
  0xe1   : > { %v515_v23 = vadd.f32 %v497_v13, %v456_v15  ;;  %v457_v27 = vadd.f32 %v440_v28, %v394_v21  ;;  %v580_v38 = vadd.f32 %v579_v34, %v573_v30 }
  0xe2   : > { %v395_v31 = vadd.f32 %v387_v24, %v335_v7  ;;  %v498_v32 = vrot.slane %v474_v25, 1  ;;  %v601_v45 = vadd.f32 %v600_v44, %v594_v35 }
  0xe3   : > { %523 = vst [vmem:[%s1246_s18 + $0x28] sm:$0xff] %v515_v23  ;;  %v574_v29 = vsel %vm550_vm6, %v515_v23, 0.0  ;;  %v461_v33 = vpop.permute.xlu1 %460 }
  0xe4   : > { %v475_v36 = vmul.f32 %v1270_v20, %v461_v33  ;;  %v499_v39 = vsel %vm425_vm0, %v496_v51, %v498_v32  ;;  %v595_v40 = vmul.f32 %v574_v29, %v574_v29  ;;  %v458_v43 = vadd.f32 %v442_v37, %v395_v31 }
  0xe5   : > { %v516_v41 = vadd.f32 %v499_v39, %v457_v27  ;;  %v581_v46 = vadd.f32 %v580_v38, %v574_v29 }
  0xe6   : > { %v500_v42 = vrot.slane %v475_v36, 1  ;;  %v602_v50 = vadd.f32 %v601_v45, %v595_v40 }
  0xe7   : > { %524 = vst [vmem:[%s1246_s18 + $0x30] sm:$0xff] %v516_v41  ;;  %v575_v20 = vsel %vm551_vm7, %v516_v41, 0.0 }
  0xe8   : > { %v501_v47 = vsel %vm425_vm0, %v498_v32, %v500_v42  ;;  %v596_v48 = vmul.f32 %v575_v20, %v575_v20  ;;  %v582_v19 = vadd.f32 %v581_v46, %v575_v20 }
  0xe9   : > { %v517_v49 = vadd.f32 %v501_v47, %v458_v43 }
  0xea   : > { %v603_v53 = vadd.f32 %v602_v50, %v596_v48 }
  0xeb   : > { %525 = vst [vmem:[%s1246_s18 + $0x38] sm:$0xff] %v517_v49  ;;  %v576_v52 = vsel %vm552_vm8, %v517_v49, 0.0 }
  0xec   : > { %v583_v54 = vadd.f32 %v582_v19, %v576_v52  ;;  %v597_v55 = vmul.f32 %v576_v52, %v576_v52 }
  0xed   : > { %932 = shalt.err (!%p929_p2)
}
  0xee   : > { %s933_s18 = scalar_lea.hbm %s1383_s27, 1024  ;;  %s937_s17 = scalar_lea.hbm %s1492_s3, 8192 }
  0xef   : > { %p934_p5 = scmp.ne.s32.totalorder %s1383_s27, %s933_s18  ;;  %p938_p9 = scmp.lt.u32.totalorder %s1383_s27, %s1492_s3 }
  0xf0   : > { %p939_p10 = scmp.lt.u32.totalorder %s937_s17, %s933_s18  ;;  %p941_p0 = scmp.lt.u32.totalorder %s933_s18, %s1383_s27 }
  0xf1   : > { %p935_p6 = pnand %p934_p5, %p1176_p3 }
  0xf2   : > { %p940_p11 = por %p939_p10, %p938_p9 }
  0xf3   : > { %p936_p8 = pneg %p935_p6 }
  0xf4   : > { %p942_p1 = por %p941_p0, %p940_p11 }
  0xf6   : > { %p943_p4 = pnand %p942_p1, %p936_p8 }
  0xf8   : > { %946 = shalt.err (!%p943_p4)
}
  0xf9   : > { %s1075_s24 = smov 128   ;;  %s1076_s28 = smov 8   ;;  %v584_v56 = vrot.slane %v583_v54, 4  ;;  %v604_v57 = vadd.f32 %v603_v53, %v597_v55  ;;  %vm612_vm9 = vcmask 1040384   ;;  %v611_v6 = vld [vmem:[%s1248_s25] sm:$0x3] }
  0xfa   : > { %805 = dma.vmem_to_hbm [thread:$0]  (%p1176_p3), %s1385_s10, 1024, %s1383_s27, %s1390_s5, %s1075_s24, %s1075_s24, %s1076_s28  }
  0xfb   : > { %v585_v58 = vadd.f32 %v584_v56, %v583_v54  ;;  %v605_v59 = vrot.slane %v604_v57, 4  ;;  %s653_s7 = sshll.u32 %s1248_s25, 4  ;;  %s1421_s14 = scalar_lea.hbm %s1493_s4, %s800_s21  ;;  %s1423_s7 = int_to_ptr.vmem [resolvable:$true] %s653_s7 }
  0xfc   : > { %s1528_s26 = sand.u32 1, %s1033_s16   ;;  %s947_s30 = scalar_lea.vmem %s1423_s7, 32 }
  0xfd   : > { %v586_v60 = vrot.slane %v585_v58, 2  ;;  %v606_v61 = vadd.f32 %v605_v59, %v604_v57  ;;  %s622_s27 = scalar_lea.sflag [#allocation5], %s1528_s26  ;;  %p948_p3 = scmp.ne.s32.totalorder %s1423_s7, %s947_s30 }
  0xfe   : > { %s1077_s5 = smov [#allocation4]  }
  0xff   : > { %v587_v62 = vadd.f32 %v586_v60, %v585_v58  ;;  %v607_v63 = vrot.slane %v606_v61, 2  ;;  %p949_p2 = pnand %p948_p3, %p1203_p12  ;;  %s951_s22 = sshll.u32 %s1077_s5, 4  ;;  %s952_s22 = int_to_ptr.vmem [resolvable:$false] %s951_s22 }
 0x100   : > { %s953_s6 = scalar_lea.vmem %s952_s22, 64  ;;  %p954_p6 = scmp.lt.s32.totalorder %s1423_s7, %s952_s22 }
 0x101   : > { %v588_v0 = vrot.slane %v587_v62, 1  ;;  %v608_v1 = vadd.f32 %v607_v63, %v606_v61  ;;  %p950_p5 = pneg %p949_p2  ;;  %p955_p8 = scmp.lt.s32.totalorder %s953_s6, %s947_s30 }
 0x103   : > { %v609_v2 = vrot.slane %v608_v1, 1  ;;  %v589_v3 = vadd.f32 %v588_v0, %v587_v62  ;;  %p956_p9 = por %p955_p8, %p954_p6 }
 0x105   : > { %v610_v5 = vadd.f32 %v609_v2, %v608_v1  ;;  %p957_p10 = pnand %p956_p9, %p950_p5 }
 0x107   : > { %v613_v7 = vsel %vm612_vm9, %v589_v3, %v610_v5 }
 0x108   : > { %v614_v8 = vadd.f32 %v613_v7, %v611_v6 }
 0x10a   : > { %615 = vst [vmem:[%s1248_s25] sm:$0x3] %v614_v8 }
 0x10b   : > { %960 = shalt.err (!%p957_p10)
}
 0x10c   : > { %s961_s25 = scalar_lea.hbm %s1421_s14, 32  ;;  %s965_s9 = scalar_lea.hbm %s1493_s4, 64 }
 0x10d   : > { %p962_p11 = scmp.ne.s32.totalorder %s1421_s14, %s961_s25  ;;  %p966_p4 = scmp.lt.u32.totalorder %s1421_s14, %s1493_s4 }
 0x10e   : > { %p967_p3 = scmp.lt.u32.totalorder %s965_s9, %s961_s25  ;;  %p969_p5 = scmp.lt.u32.totalorder %s961_s25, %s1421_s14 }
 0x10f   : > { %p963_p0 = pnand %p962_p11, %p1203_p12 }
 0x110   : > { %p968_p2 = por %p967_p3, %p966_p4 }
 0x111   : > { %p964_p1 = pneg %p963_p0 }
 0x112   : > { %p970_p6 = por %p969_p5, %p968_p2 }
 0x114   : > { %p971_p8 = pnand %p970_p6, %p964_p1 }
 0x116   : > { %974 = shalt.err (!%p971_p8)
}
 0x117   : > { %806 = dma.vmem_to_hbm [thread:$0]  (%p1203_p12), %s1423_s7, 32, %s1421_s14, %s622_s27  }
 0x118 PF: > { %s1529_s12 = sld [smem:[#allocation14_spill]]  ;;  %s1530_s15 = sld [smem:[#allocation10_spill]] }
 0x11e   : > { %p816_p9 = scmp.ge.s32.totalorder %s1529_s12, 2  ;;  %s665_s20 = sand.u32 1, %s1530_s15  }
 0x11f   : > { %s666_s23 = scalar_lea.sflag [#allocation3], %s665_s20 }
 0x120   : > { %p810_p10 = pnand %p816_p9, %p1191_p7 }
 0x122   : > { %1020 = dma.done.wait (!%p810_p10), %s666_s23, 1024  }
 0x123   : > { %1022 = vsyncadd (!%p810_p10), %s666_s23, 4294966272  ;;  %s1532_s24 = sld [smem:[#allocation8_spill]]  ;;  %p813_p11 = pnand %p816_p9, %p1215_p13 }
 0x129   : > { %s674_s29 = sand.u32 1, %s1532_s24  }
 0x12a   : > { %s675_s13 = scalar_lea.sflag [#allocation5], %s674_s29 }
 0x12b   : > { %1024 = dma.done.wait (!%p813_p11), %s675_s13, 32  }
 0x12c   : > { %1026 = vsyncadd (!%p813_p11), %s675_s13, 4294967264  ;;  %s21_s25 = sadd.s32 1, %s1529_s12   ;;  %s1534_s7 = sld [smem:[#allocation9_spill]] }
 0x12d   : > { %p18_p12 = scmp.ge.s32.totalorder %s21_s25, 10   ;;  %s1535_s17 = sld [smem:[#allocation18_spill]] }
 0x12e   : > { %s1536_s10 = sld [smem:[#allocation11_spill]]  ;;  %s1537_s20 = sld [smem:[#allocation19_spill]] }
 0x12f   : > { %s1538_s21 = sld [smem:[#allocation12_spill]]  ;;  %s1539_s22 = sld [smem:[#allocation13_spill]] }
 0x130   : > { %s1540_s23 = sld [smem:[#allocation15_spill]]  ;;  %s1541_s24 = sld [smem:[#allocation16_spill]] }
 0x131   : > { %s1542_s15 = smov %s1033_s16  ;;  %s1544_s18 = smov %s1045_s19 }
 0x132   : > { %s1543_s16 = smov %s1534_s7  ;;  %20 = sbr.rel (!%p18_p12) target bundleno = 9 (0x9), region = 92 }
 0x134   : > { %s1545_s19 = smov %s1536_s10 }
 0x139   :  { %680 = vsyncpa [#allocation3], 1 }
 0x13a   :  { %682 = vsyncpa [#allocation3 + $0x1], 1 }
 0x13b   :  { %683 = vsyncpa [#allocation5], 1 }
 0x13c   :  { %685 = vsyncpa [#allocation5 + $0x1], 1 }

</bundles_post_ra>
